<compile_context>
chip_gen: v6e
topology: v6e:2x2x1
jax: 0.10.0
libtpu: 0.0.40
codegen_flags: <defaults>
</compile_context>

<pallas_src>
import jax
import jax.numpy as jnp
from jax.experimental import pallas as pl
from jax.experimental.pallas import tpu as pltpu

SUBLANE = 8


def _round_up(n, m):
    return ((n + m - 1) // m) * m


def actor_cate_kernel(x_ref, w1_ref, b1_ref, w2_ref, b2_ref, w3_ref, b3_ref,
                      out_ref):
    x = x_ref[...]

    # Layer 1: Linear(state_dim, 64) + Tanh (f32 accumulation / activation)
    h1 = jnp.dot(x, w1_ref[...], preferred_element_type=jnp.float32)
    h1 = jnp.tanh(h1 + b1_ref[...])

    # Layer 2: Linear(64, 32) + Tanh
    h2 = jnp.dot(h1.astype(w2_ref.dtype), w2_ref[...],
                 preferred_element_type=jnp.float32)
    h2 = jnp.tanh(h2 + b2_ref[...])

    # Layer 3: Linear(32, n_actions)
    logits = jnp.dot(h2.astype(w3_ref.dtype), w3_ref[...],
                     preferred_element_type=jnp.float32)
    logits = logits + b3_ref[...]

    # Numerically stable softmax over the last (lane) axis. Exact divide so the
    # probabilities are normalized to f32 rounding (cheap: kernel is HBM-bound).
    m = jnp.max(logits, axis=-1, keepdims=True)
    e = jnp.exp(logits - m)
    denom = jnp.sum(e, axis=-1, keepdims=True)
    out_ref[...] = (e / denom).astype(out_ref.dtype)


def actor_cate_forward(x, params, *, block_b=2048, compute_dtype=jnp.bfloat16):
    """x: (batch, state_dim) float32. Returns (batch, n_actions) float32."""
    w1, b1, w2, b2, w3, b3 = params
    batch, state_dim = x.shape
    hid1 = w1.shape[1]
    hid2 = w2.shape[1]
    n_actions = w3.shape[1]

    # Batch tiling: round rows to sublanes; big tiles amortize per-step
    # overhead, but keep >= 2 grid steps when possible so v7x's second
    # TensorCore is used ("parallel" grid axis).
    batch_pad = _round_up(batch, SUBLANE)
    if batch_pad >= 2 * SUBLANE:
        tile_b = min(block_b, _round_up((batch_pad + 1) // 2, SUBLANE))
    else:
        tile_b = batch_pad
    batch_pad = _round_up(batch_pad, tile_b)
    grid = (batch_pad // tile_b,)

    # MXU-input dtype casts (tiny; fuse/hoist under jit). Biases stay f32 —
    # they are added to the f32 accumulators.
    x_c = x.astype(compute_dtype)
    if batch_pad != batch:
        x_c = jnp.pad(x_c, ((0, batch_pad - batch), (0, 0)))
    w1_c = w1.astype(compute_dtype)
    w2_c = w2.astype(compute_dtype)
    w3_c = w3.astype(compute_dtype)
    b1_c = b1.reshape(1, hid1).astype(jnp.float32)
    b2_c = b2.reshape(1, hid2).astype(jnp.float32)
    b3_c = b3.reshape(1, n_actions).astype(jnp.float32)

    resident = lambda i: (0, 0)  # weights/biases: same block every grid step

    out_p = pl.pallas_call(
        actor_cate_kernel,
        out_shape=jax.ShapeDtypeStruct((batch_pad, n_actions), jnp.float32),
        grid=grid,
        in_specs=[
            pl.BlockSpec((tile_b, state_dim), lambda i: (i, 0)),
            pl.BlockSpec((state_dim, hid1), resident),
            pl.BlockSpec((1, hid1), resident),
            pl.BlockSpec((hid1, hid2), resident),
            pl.BlockSpec((1, hid2), resident),
            pl.BlockSpec((hid2, n_actions), resident),
            pl.BlockSpec((1, n_actions), resident),
        ],
        out_specs=pl.BlockSpec((tile_b, n_actions), lambda i: (i, 0)),
        compiler_params=pltpu.CompilerParams(
            dimension_semantics=("parallel",),
        ),
    )(x_c, w1_c, b1_c, w2_c, b2_c, w3_c, b3_c)

    if batch_pad != batch:
        out_p = out_p[:batch]
    return out_p


def actor_cate_reference(x, params):
    """Pure-JAX reference matching the PyTorch module."""
    w1, b1, w2, b2, w3, b3 = params
    h = jnp.tanh(x @ w1 + b1)
    h = jnp.tanh(h @ w2 + b2)
    logits = h @ w3 + b3
    return jax.nn.softmax(logits, axis=-1)


def init_params(key, state_dim, n_actions):
    """Deterministic PyTorch-Linear-style init: U(-1/sqrt(fan_in), 1/sqrt(fan_in))."""
    dims = [(state_dim, 64), (64, 32), (32, n_actions)]
    params = []
    for (fan_in, fan_out) in dims:
        key, kw, kb = jax.random.split(key, 3)
        bound = 1.0 / jnp.sqrt(jnp.float32(fan_in))
        w = jax.random.uniform(kw, (fan_in, fan_out), jnp.float32,
                               minval=-bound, maxval=bound)
        b = jax.random.uniform(kb, (1, fan_out), jnp.float32,
                               minval=-bound, maxval=bound)
        params.extend([w, b])
    return tuple(params)


if __name__ == "__main__":
    state_dim = 16
    n_actions = 8
    batch = 8

    key = jax.random.PRNGKey(0)
    key, kx = jax.random.split(key)
    x = jax.random.normal(kx, (batch, state_dim), jnp.float32)
    params = init_params(key, state_dim, n_actions)

    fwd = jax.jit(actor_cate_forward, static_argnames=("block_b", "compute_dtype"))

    ref = actor_cate_reference(x, params)

    # Exact-f32 path: tight tolerance.
    out_f32 = jax.block_until_ready(fwd(x, params, compute_dtype=jnp.float32))
    assert out_f32.shape == (batch, n_actions)
    assert jnp.allclose(jnp.sum(out_f32, axis=-1), 1.0, atol=1e-5)
    assert jnp.allclose(out_f32, ref, atol=1e-5, rtol=1e-5), \
        float(jnp.max(jnp.abs(out_f32 - ref)))

    # Default (bf16 MXU inputs, f32 accumulation/softmax): looser tolerance.
    out = jax.block_until_ready(fwd(x, params))
    assert out.shape == (batch, n_actions)
    assert jnp.allclose(jnp.sum(out, axis=-1), 1.0, atol=1e-3)
    assert jnp.allclose(out, ref, atol=2e-2, rtol=2e-2), \
        float(jnp.max(jnp.abs(out - ref)))

    print("KERNEL_OK")
</pallas_src>

<mosaic_0001>
module attributes {stable_mosaic.version = 11 : i64} {
  func.func @actor_cate_kernel(%arg0: i32, %arg1: memref<8x16xf32, #tpu.memory_space<vmem>>, %arg2: memref<16x64xf32, #tpu.memory_space<vmem>>, %arg3: memref<1x64xf32, #tpu.memory_space<vmem>>, %arg4: memref<64x32xf32, #tpu.memory_space<vmem>>, %arg5: memref<1x32xf32, #tpu.memory_space<vmem>>, %arg6: memref<32x8xf32, #tpu.memory_space<vmem>>, %arg7: memref<1x8xf32, #tpu.memory_space<vmem>>, %arg8: memref<8x8xf32, #tpu.memory_space<vmem>>) attributes {dimension_semantics = [#tpu.dimension_semantics<parallel>], iteration_bounds = array<i64: 1>, scalar_prefetch = 0 : i64, scratch_operands = 0 : i64, tpu.core_type = #tpu.core_type<tc>, window_params = [{transform_indices = @transform_0, window_bounds = array<i64: 8, 16>}, {pipeline_mode = #tpu.pipeline_mode<synchronous>, transform_indices = @transform_1, window_bounds = array<i64: 16, 64>}, {pipeline_mode = #tpu.pipeline_mode<synchronous>, transform_indices = @transform_2, window_bounds = array<i64: 1, 64>}, {pipeline_mode = #tpu.pipeline_mode<synchronous>, transform_indices = @transform_3, window_bounds = array<i64: 64, 32>}, {pipeline_mode = #tpu.pipeline_mode<synchronous>, transform_indices = @transform_4, window_bounds = array<i64: 1, 32>}, {pipeline_mode = #tpu.pipeline_mode<synchronous>, transform_indices = @transform_5, window_bounds = array<i64: 32, 8>}, {pipeline_mode = #tpu.pipeline_mode<synchronous>, transform_indices = @transform_6, window_bounds = array<i64: 1, 8>}, {transform_indices = @transform_7, window_bounds = array<i64: 8, 8>}]} {
    %c0 = arith.constant 0 : index
    %c0_0 = arith.constant 0 : index
    %0 = vector.load %arg1[%c0, %c0_0] : memref<8x16xf32, #tpu.memory_space<vmem>>, vector<8x16xf32>
    %c0_1 = arith.constant 0 : index
    %c0_2 = arith.constant 0 : index
    %1 = vector.load %arg2[%c0_1, %c0_2] : memref<16x64xf32, #tpu.memory_space<vmem>>, vector<16x64xf32>
    %cst = arith.constant dense<0.000000e+00> : vector<8x64xf32>
    %2 = tpu.matmul %0, %1, %cst {dimension_numbers = #tpu.dot_dimension_numbers<[1], [0], [0], [1], [0, 0, 1, 1], [], []>} : vector<8x16xf32>, vector<16x64xf32>, vector<8x64xf32> -> vector<8x64xf32>
    %c0_3 = arith.constant 0 : index
    %c0_4 = arith.constant 0 : index
    %3 = vector.load %arg3[%c0_3, %c0_4] : memref<1x64xf32, #tpu.memory_space<vmem>>, vector<1x64xf32>
    %4 = vector.broadcast %3 : vector<1x64xf32> to vector<8x64xf32>
    %5 = arith.addf %2, %4 : vector<8x64xf32>
    %6 = math.tanh %5 : vector<8x64xf32>
    %c0_5 = arith.constant 0 : index
    %c0_6 = arith.constant 0 : index
    %7 = vector.load %arg4[%c0_5, %c0_6] : memref<64x32xf32, #tpu.memory_space<vmem>>, vector<64x32xf32>
    %cst_7 = arith.constant dense<0.000000e+00> : vector<8x32xf32>
    %8 = tpu.matmul %6, %7, %cst_7 {dimension_numbers = #tpu.dot_dimension_numbers<[1], [0], [0], [1], [0, 0, 1, 1], [], []>} : vector<8x64xf32>, vector<64x32xf32>, vector<8x32xf32> -> vector<8x32xf32>
    %c0_8 = arith.constant 0 : index
    %c0_9 = arith.constant 0 : index
    %9 = vector.load %arg5[%c0_8, %c0_9] : memref<1x32xf32, #tpu.memory_space<vmem>>, vector<1x32xf32>
    %10 = vector.broadcast %9 : vector<1x32xf32> to vector<8x32xf32>
    %11 = arith.addf %8, %10 : vector<8x32xf32>
    %12 = math.tanh %11 : vector<8x32xf32>
    %c0_10 = arith.constant 0 : index
    %c0_11 = arith.constant 0 : index
    %13 = vector.load %arg6[%c0_10, %c0_11] : memref<32x8xf32, #tpu.memory_space<vmem>>, vector<32x8xf32>
    %cst_12 = arith.constant dense<0.000000e+00> : vector<8x8xf32>
    %14 = tpu.matmul %12, %13, %cst_12 {dimension_numbers = #tpu.dot_dimension_numbers<[1], [0], [0], [1], [0, 0, 1, 1], [], []>} : vector<8x32xf32>, vector<32x8xf32>, vector<8x8xf32> -> vector<8x8xf32>
    %c0_13 = arith.constant 0 : index
    %c0_14 = arith.constant 0 : index
    %15 = vector.load %arg7[%c0_13, %c0_14] : memref<1x8xf32, #tpu.memory_space<vmem>>, vector<1x8xf32>
    %16 = vector.broadcast %15 : vector<1x8xf32> to vector<8x8xf32>
    %17 = arith.addf %14, %16 : vector<8x8xf32>
    %cst_15 = arith.constant dense<0xFF800000> : vector<8xf32>
    %18 = vector.multi_reduction <maximumf>, %17, %cst_15 [1] : vector<8x8xf32> to vector<8xf32>
    %19 = vector.shape_cast %18 : vector<8xf32> to vector<8x1xf32>
    %20 = vector.broadcast %19 : vector<8x1xf32> to vector<8x8xf32>
    %21 = arith.subf %17, %20 : vector<8x8xf32>
    %22 = math.exp %21 : vector<8x8xf32>
    %cst_16 = arith.constant dense<0.000000e+00> : vector<8xf32>
    %23 = vector.multi_reduction <add>, %22, %cst_16 [1] : vector<8x8xf32> to vector<8xf32>
    %24 = vector.shape_cast %23 : vector<8xf32> to vector<8x1xf32>
    %25 = vector.broadcast %24 : vector<8x1xf32> to vector<8x8xf32>
    %26 = arith.divf %22, %25 : vector<8x8xf32>
    %c0_17 = arith.constant 0 : index
    %c0_18 = arith.constant 0 : index
    %27 = vector.load %arg8[%c0_17, %c0_18] : memref<8x8xf32, #tpu.memory_space<vmem>>, vector<8x8xf32>
    tpu.vector_store %arg8[%c0_17, %c0_18], %26 {strides = array<i32>} : memref<8x8xf32, #tpu.memory_space<vmem>>, vector<8x8xf32>,
    return
  }
  func.func @transform_0(%arg0: i32) -> (i32, i32) {
    %c0_i32 = arith.constant 0 : i32
    %c0_i32_0 = arith.constant 0 : i32
    return %arg0, %c0_i32 : i32, i32
  }
  func.func @transform_1(%arg0: i32) -> (i32, i32) {
    %c0_i32 = arith.constant 0 : i32
    %c0_i32_0 = arith.constant 0 : i32
    %c0_i32_1 = arith.constant 0 : i32
    return %c0_i32, %c0_i32_0 : i32, i32
  }
  func.func @transform_2(%arg0: i32) -> (i32, i32) {
    %c0_i32 = arith.constant 0 : i32
    %c0_i32_0 = arith.constant 0 : i32
    %c0_i32_1 = arith.constant 0 : i32
    return %c0_i32, %c0_i32_0 : i32, i32
  }
  func.func @transform_3(%arg0: i32) -> (i32, i32) {
    %c0_i32 = arith.constant 0 : i32
    %c0_i32_0 = arith.constant 0 : i32
    %c0_i32_1 = arith.constant 0 : i32
    return %c0_i32, %c0_i32_0 : i32, i32
  }
  func.func @transform_4(%arg0: i32) -> (i32, i32) {
    %c0_i32 = arith.constant 0 : i32
    %c0_i32_0 = arith.constant 0 : i32
    %c0_i32_1 = arith.constant 0 : i32
    return %c0_i32, %c0_i32_0 : i32, i32
  }
  func.func @transform_5(%arg0: i32) -> (i32, i32) {
    %c0_i32 = arith.constant 0 : i32
    %c0_i32_0 = arith.constant 0 : i32
    %c0_i32_1 = arith.constant 0 : i32
    return %c0_i32, %c0_i32_0 : i32, i32
  }
  func.func @transform_6(%arg0: i32) -> (i32, i32) {
    %c0_i32 = arith.constant 0 : i32
    %c0_i32_0 = arith.constant 0 : i32
    %c0_i32_1 = arith.constant 0 : i32
    return %c0_i32, %c0_i32_0 : i32, i32
  }
  func.func @transform_7(%arg0: i32) -> (i32, i32) {
    %c0_i32 = arith.constant 0 : i32
    %c0_i32_0 = arith.constant 0 : i32
    return %arg0, %c0_i32 : i32, i32
  }
}

</mosaic_0001>

<bundles_post_ra>
// kernel: actor_cate_forward.1
= control target key start
LH: loop header
LB: loop body
LE: loop exit
PB: predicated region body
PF: predicated region fallthrough
CT: control target
= control target key end

     0   :  { %v407_v1 = vmov 0.0   ;;  %vm408_vm0 = vmmov 0   ;;  %s510_s0 = inlined_call_operand.vmem [shape: f32[8,16], index: 0, kind: input, shape index: {}]   ;;  %s511_s1 = inlined_call_operand.vmem [shape: f32[16,64], index: 1, kind: input, shape index: {}]   ;;  %s512_s2 = inlined_call_operand.vmem [shape: f32[1,64], index: 2, kind: input, shape index: {}]   ;;  %s513_s3 = inlined_call_operand.vmem [shape: f32[64,32], index: 3, kind: input, shape index: {}]   ;;  %s514_s4 = inlined_call_operand.vmem [shape: f32[1,32], index: 4, kind: input, shape index: {}]   ;;  %s515_s5 = inlined_call_operand.vmem [shape: f32[32,8], index: 5, kind: input, shape index: {}]   ;;  %s516_s6 = inlined_call_operand.vmem [shape: f32[1,8], index: 6, kind: input, shape index: {}]   ;;  %s517_s7 = inlined_call_operand.hbm [shape: f32[8,8], index: 7, kind: output, shape index: {}]  }
   0x1   :  { %v29_v0 = vld [vmem:[%s511_s1 + $0x8] sm:$0xff]  ;;  %337 = vmatprep.subr.mxu0 %v407_v1  ;;  %v28_v2 = vld [vmem:[%s511_s1] sm:$0xff]  ;;  %341 = vmatprep.mubr.msk.f32.mxu0 %vm408_vm0, %v407_v1 }
   0x2   :  { %12 = vsyncpa [#allocation3], 0  ;;  %338 = vmatpush3.msra.mxu0 %v29_v0  ;;  %v27_v3 = vld [vmem:[%s510_s0] sm:$0xff]  ;;  %vm37_vm1 = vcmask 130048   ;;  %344 = vmatprep.subr.mxu1 %v407_v1  ;;  %v119_v4 = vld [vmem:[%s513_s3 + $0x38] sm:$0xff]  ;;  %vm127_vm2 = vcmask 523264  }
   0x3   :  { %339 = vmatprep.subr.mxu0 %v407_v1  ;;  %360 = vmatprep.mubr.msk.f32.mxu1 %vm408_vm0, %v407_v1  ;;  %v118_v5 = vld [vmem:[%s513_s3 + $0x30] sm:$0xff]  ;;  %v117_v6 = vld [vmem:[%s513_s3 + $0x28] sm:$0xff]  ;;  %v116_v7 = vld [vmem:[%s513_s3 + $0x20] sm:$0xff]  ;;  %vm213_vm3 = vcmask 261120   ;;  %vm287_vm4 = vcmask 64512  }
   0x4   :  { %340 = vmatpush3.msra.mxu0 %v28_v2  ;;  %345 = vmatpush3.msra.mxu1 %v119_v4  ;;  %v115_v8 = vld [vmem:[%s513_s3 + $0x18] sm:$0xff]  ;;  %v114_v9 = vld [vmem:[%s513_s3 + $0x10] sm:$0xff]  ;;  %v113_v10 = vld [vmem:[%s513_s3 + $0x8] sm:$0xff] }
   0x5   :  { %342 = vmatmul.mubr.msk.f32.vlgmr.msra.gmra.mxu0 %vm37_vm1, %v27_v3  ;;  %363 = vmatprep.subr.mxu0 %v407_v1  ;;  %v112_v11 = vld [vmem:[%s513_s3] sm:$0xff]  ;;  %v205_v17 = vld [vmem:[%s515_s5 + $0x18] sm:$0xff]  ;;  %v204_v18 = vld [vmem:[%s515_s5 + $0x10] sm:$0xff] }
   0x6   :  { %371 = vmatprep.mubr.msk.f32.mxu0 %vm408_vm0, %v407_v1  ;;  %346 = vmatprep.subr.mxu1 %v407_v1  ;;  %v314_v12 = vld [vmem:[%s512_s2] ss:$0 sm:$0xff]  ;;  %v203_v19 = vld [vmem:[%s515_s5 + $0x8] sm:$0xff] }
   0x7   :  { %347 = vmatpush3.msra.mxu1 %v118_v5  ;;  %364 = vmatpush3.msra.mxu0 %v205_v17  ;;  %v202_v20 = vld [vmem:[%s515_s5] sm:$0xff] }
   0x8   :  { %348 = vmatprep.subr.mxu1 %v407_v1  ;;  %365 = vmatprep.subr.mxu0 %v407_v1  ;;  %v316_v21 = vld [vmem:[%s514_s4] ss:$0 sm:$0xff]  ;;  %s409_s4 = smov [#allocation2]  }
   0x9   :  { %349 = vmatpush3.msra.mxu1 %v117_v6  ;;  %366 = vmatpush3.msra.mxu0 %v204_v18  ;;  %v318_v26 = vld [vmem:[%s516_s6] ss:$0 sm:$0xff]  ;;  %s306_s5 = sshll.u32 %s409_s4, 4  ;;  %s307_s5 = int_to_ptr.vmem [resolvable:$true] %s306_s5 }
   0xa   :  { %350 = vmatprep.subr.mxu1 %v407_v1  ;;  %367 = vmatprep.subr.mxu0 %v407_v1  ;;  %s385_s6 = scalar_lea.vmem %s307_s5, 128  ;;  %p390_p1 = scmp.lt.s32.totalorder %s307_s5, %s307_s5 }
   0xb   :  { %351 = vmatpush3.msra.mxu1 %v116_v7  ;;  %368 = vmatpush3.msra.mxu0 %v203_v19  ;;  %p386_p0 = scmp.ne.s32.totalorder %s307_s5, %s385_s6  ;;  %p391_p2 = scmp.lt.s32.totalorder %s385_s6, %s385_s6 }
   0xc   :  { %352 = vmatprep.subr.mxu1 %v407_v1  ;;  %369 = vmatprep.subr.mxu0 %v407_v1 }
   0xd   :  { %353 = vmatpush3.msra.mxu1 %v115_v8  ;;  %370 = vmatpush3.msra.mxu0 %v202_v20  ;;  %p392_p3 = por %p391_p2, %p390_p1 }
   0xe   :  { %354 = vmatprep.subr.mxu1 %v407_v1 }
   0xf   :  { %355 = vmatpush3.msra.mxu1 %v114_v9  ;;  %p393_p4 = pnand %p392_p3, %p386_p0 }
  0x10   :  { %356 = vmatprep.subr.mxu1 %v407_v1 }
  0x11   :  { %357 = vmatpush3.msra.mxu1 %v113_v10 }
  0x12   :  { %358 = vmatprep.subr.mxu1 %v407_v1 }
  0x13   :  { %359 = vmatpush3.msra.mxu1 %v112_v11 }
  0xc5   :  { %v107_v13 = vpop.f32.mrf.mxu0 }
  0xc6   :  { %v108_v14 = vadd.f32 %v314_v12, %v107_v13 }
  0xc7   :  { %v343_v15 = vpop.f32.mrf.mxu0 }
  0xc8   :  { %377 = vtanh.f32 %v108_v14 }
  0xd5   :  { %v378_v16 = vpop.eup %377 }
  0xd6   :  { %361 = vmatmul.mubr.msk.f32.vlgmr.msra.gmra.mxu1 %vm127_vm2, %v378_v16 }
 0x196   :  { %v197_v22 = vpop.f32.mrf.mxu1 }
 0x197   :  { %v198_v23 = vadd.f32 %v316_v21, %v197_v22 }
 0x198   :  { %v362_v24 = vpop.f32.mrf.mxu1 }
 0x199   :  { %379 = vtanh.f32 %v198_v23 }
 0x1a6   :  { %v380_v25 = vpop.eup %379 }
 0x1a7   :  { %372 = vmatmul.mubr.msk.f32.vlgmr.msra.gmra.mxu0 %vm213_vm3, %v380_v25 }
 0x267   :  { %v283_v27 = vpop.f32.mrf.mxu0 }
 0x268   :  { %v284_v28 = vadd.f32 %v318_v26, %v283_v27 }
 0x269   :  { %v373_v29 = vpop.f32.mrf.mxu0 }
 0x26a   :  { %v288_v30 = vsel %vm287_vm4, %v284_v28, -inf }
 0x26b   :  { %289 = vmax.xlane.f32.xlu0 %v288_v30 }
 0x2f4   :  { %v290_v31 = vpop.xlane.xlu0 %289 }
 0x2f5   :  { %v291_v32 = vsub.f32 %v284_v28, %v290_v31 }
 0x2f7   :  { %v292_v33 = vmul.f32 1.442695, %v291_v32 }
 0x2f9   :  { %381 = vpow2.f32 %v292_v33 }
 0x306   :  { %v382_v34 = vpop.eup %381 }
 0x307   :  { %v294_v35 = vsel %vm287_vm4, %v382_v34, 0.0 }
 0x308   :  { %295 = vadd.xlane.f32.xlu0 %v294_v35 }
 0x391   :  { %v296_v36 = vpop.xlane.xlu0 %295 }
 0x392   :  { %383 = vrcp.f32 %v296_v36 }
 0x39f   :  { %v384_v37 = vpop.eup %383 }
 0x3a0   :  { %v298_v38 = vmul.f32 %v384_v37, %v382_v34 }
 0x3a2   :  { %299 = vst.msk [vmem:[#allocation2] sm:$0xff] %vm287_vm4, %v298_v38 }
 0x3a3   :  { %396 = shalt.err (!%p393_p4)
}
 0x3a4   :  { %309 = dma.vmem_to_hbm [thread:$0]  %s307_s5, 128, %s517_s7, [#allocation3]  }
 0x3a5   :  { %405 = dma.done.wait [#allocation3], 128  }
 0x3a6   :  { %406 = vsyncadd [#allocation3], 4294967168 }
 0x3a7   :  { %313 = vsyncpa [#allocation3], 1 }

</bundles_post_ra>
